<compile_context>
chip_gen: v7x
topology: tpu7x:2x2x1
jax: 0.10.0
libtpu: 0.0.40
codegen_flags: <defaults>
</compile_context>

<pallas_src>
import functools

import jax
import jax.numpy as jnp
from jax.experimental import pallas as pl
from jax.experimental.pallas import tpu as pltpu


def _round_up(n, m):
    return ((n + m - 1) // m) * m


@functools.lru_cache(maxsize=1)
def _num_tensorcores():
    """Best-effort TensorCores-per-chip (v7x / megacore chips: 2, v5e/v6e: 1)."""
    try:
        kind = jax.devices()[0].device_kind.lower()
    except Exception:
        return 1
    if any(tag in kind for tag in ("v7", "7x", "v4", "v5p")):
        return 2
    return 1


# Rough per-batch-row VMEM footprint at f32 activations: double-buffered
# x / out blocks plus a few live 128-wide activation slabs (~4 KiB / row).
_VMEM_BYTES_PER_ROW = 4 * 1024
_VMEM_TILE_BUDGET = 24 << 20        # stay well under v7x's 64 MiB physical VMEM


def _choose_tile(batch, cap):
    """Pick the batch-tile size (rows per grid step).

    On 1-TC chips (v5e/v6e) the grid is a serial loop, so use a single tile
    whenever the batch fits (splitting only adds ~0.35us/step overhead).  On
    2-TC chips (v7x) force >=2 tiles so dimension_semantics=("parallel",)
    gives both TensorCores work.
    """
    cap = max(8, min(cap, _VMEM_TILE_BUDGET // _VMEM_BYTES_PER_ROW))
    b8 = _round_up(max(batch, 1), 8)
    n_tiles = -(-b8 // cap)
    if _num_tensorcores() >= 2 and b8 > 8:
        n_tiles = max(n_tiles, 2)
    return _round_up(-(-b8 // n_tiles), 8)


def _mlp_kernel(x_ref, t_ref, w1x_ref, w1t_ref, b1_ref, wh_ref, bh_ref,
                w6_ref, b6_ref, o_ref, *, inv_num_steps):
    """One batch tile of the 6-layer MLP (5 hidden ReLU layers + linear head).

    Weight feature dims are pre-padded to multiples of 128 (lane-dense) with
    zeros, so padded lanes never change the result.  Matmuls run on the MXU in
    bf16 with f32 accumulation; bias-add / ReLU stay in f32 (portable to v5e,
    which has no bf16 VPU).
    """
    t = t_ref[...].astype(jnp.float32) * inv_num_steps      # (bb, 1) == t / num_steps

    # Layer 1: the timestep column of W1 is fused as a broadcast mul-add,
    # avoiding a concat([x, t]) HBM round trip.
    h = jnp.dot(x_ref[...].astype(jnp.bfloat16), w1x_ref[...],
                preferred_element_type=jnp.float32)
    h = jnp.maximum(h + t * w1t_ref[...] + b1_ref[...], 0.0)

    for layer in range(4):                                   # static unroll
        h = jnp.dot(h.astype(jnp.bfloat16), wh_ref[layer],
                    preferred_element_type=jnp.float32) + bh_ref[layer]
        h = jnp.maximum(h, 0.0)

    o_ref[...] = (jnp.dot(h.astype(jnp.bfloat16), w6_ref[...],
                          preferred_element_type=jnp.float32)
                  + b6_ref[...]).astype(o_ref.dtype)


@functools.partial(jax.jit, static_argnames=("num_steps", "d_out", "block_cap"))
def diffusion_policy_forward(x, t, packed, *, num_steps, d_out, block_cap=4096):
    """x: (B, state_dim + action_dim*horizon), t: (B,) timesteps (any dtype).

    `packed` is the output of pack_params (lane-padded, bf16 matmul weights).
    """
    w1x, w1t, b1, wh, bh, w6, b6 = packed
    B, d_x = x.shape
    h_pad = wh.shape[-1]
    dout_pad = w6.shape[1]

    block_b = _choose_tile(B, block_cap)
    grid = (pl.cdiv(B, block_b),)

    t2 = t.reshape(-1, 1)                       # native dtype; kernel casts

    def batch_spec(width):
        return pl.BlockSpec((block_b, width), lambda i: (i, 0))

    def resident_spec(arr):
        # Constant block index -> weights stay resident across batch tiles.
        # TODO(synk): pipeline_mode=pl.Buffered(1) on these resident specs once
        # single-buffered blocks are confirmed on the target jax release.
        shape = arr.shape
        return pl.BlockSpec(shape, lambda i: (0,) * len(shape))

    in_specs = [batch_spec(d_x), batch_spec(1)]
    in_specs += [resident_spec(a) for a in packed]

    flops = 2 * B * (d_x * h_pad + 4 * h_pad * h_pad + h_pad * dout_pad)
    weight_bytes = sum(int(a.size) * a.dtype.itemsize for a in packed)
    bytes_accessed = (int(x.size) * x.dtype.itemsize
                      + int(t2.size) * t2.dtype.itemsize
                      + B * dout_pad * 4 + weight_bytes)

    out = pl.pallas_call(
        functools.partial(_mlp_kernel, inv_num_steps=1.0 / float(num_steps)),
        out_shape=jax.ShapeDtypeStruct((B, dout_pad), jnp.float32),
        grid_spec=pltpu.PrefetchScalarGridSpec(
            num_scalar_prefetch=0,
            grid=grid,
            in_specs=in_specs,
            out_specs=batch_spec(dout_pad),
        ),
        compiler_params=pltpu.CompilerParams(
            dimension_semantics=("parallel",),
            vmem_limit_bytes=40 * 1024 * 1024),
        cost_estimate=pl.CostEstimate(
            flops=flops, transcendentals=0, bytes_accessed=bytes_accessed),
    )(x, t2, *packed)

    # TODO(synk): callers that can consume the padded (B, 128) slab (or bf16
    # output) directly can skip this column slice.
    return out[:, :d_out]


def init_diffusion_policy_params(key, state_dim, action_dim, hidden_dim,
                                 prediction_horizon):
    """Deterministic init matching the nn.Sequential layer shapes.

    Weights stored as (in_features, out_features) so the kernel does h @ W;
    biases stored as (1, out_features)."""
    in_dim = state_dim + action_dim * prediction_horizon + 1
    out_dim = action_dim * prediction_horizon
    dims = [in_dim] + [hidden_dim] * 5 + [out_dim]
    params = []
    for li in range(6):
        key, kw, kb = jax.random.split(key, 3)
        bound = 1.0 / float(dims[li]) ** 0.5     # PyTorch Linear default bound
        w = jax.random.uniform(kw, (dims[li], dims[li + 1]), jnp.float32,
                               minval=-bound, maxval=bound)
        b = jax.random.uniform(kb, (1, dims[li + 1]), jnp.float32,
                               minval=-bound, maxval=bound)
        params.append((w, b))
    return tuple(params)


def pack_params(params, *, d_x, hidden_dim, d_out):
    """One-time host-side pack: split W1 into (x-part, t-column), pad feature
    dims to multiples of 128 (lane-dense), stack the 4 hidden layers into one
    array, and store the big matmul weights in bf16 (f32 accumulation in the
    kernel).  Biases and the tiny t-column stay f32."""
    h_pad = _round_up(hidden_dim, 128)
    dout_pad = _round_up(d_out, 128)
    (w1, b1) = params[0]
    (w6, b6) = params[5]

    def pad2(a, rows, cols):
        return jnp.pad(a, ((0, rows - a.shape[0]), (0, cols - a.shape[1])))

    w1x = pad2(w1[:d_x], d_x, h_pad).astype(jnp.bfloat16)
    w1t = pad2(w1[d_x:d_x + 1], 1, h_pad)                      # f32 (tiny)
    b1p = pad2(b1, 1, h_pad)
    wh = jnp.stack([pad2(w, h_pad, h_pad) for (w, _) in params[1:5]]
                   ).astype(jnp.bfloat16)                       # (4, h_pad, h_pad)
    bh = jnp.stack([pad2(b, 1, h_pad) for (_, b) in params[1:5]])  # (4, 1, h_pad)
    w6p = pad2(w6, h_pad, dout_pad).astype(jnp.bfloat16)
    b6p = pad2(b6, 1, dout_pad)
    return (w1x, w1t, b1p, wh, bh, w6p, b6p)


def reference_forward(x, t, params, num_steps):
    """Exact f32 plain-JAX reference of the original DiffusionPolicy.forward."""
    t_feat = (t.astype(jnp.float32) / float(num_steps)).reshape(-1, 1)
    h = jnp.concatenate([x.astype(jnp.float32), t_feat], axis=-1)
    for i, (w, b) in enumerate(params):
        h = h @ w + b
        if i < 5:
            h = jnp.maximum(h, 0.0)
    return h


def reference_forward_bf16(x, t, packed, num_steps, d_out):
    """Plain-JAX mirror of the kernel's bf16-weight / f32-accumulate math."""
    w1x, w1t, b1, wh, bh, w6, b6 = packed
    t_feat = (t.astype(jnp.float32) / float(num_steps)).reshape(-1, 1)
    h = jnp.dot(x.astype(jnp.bfloat16), w1x, preferred_element_type=jnp.float32)
    h = jnp.maximum(h + t_feat * w1t + b1, 0.0)
    for i in range(4):
        h = jnp.dot(h.astype(jnp.bfloat16), wh[i],
                    preferred_element_type=jnp.float32) + bh[i]
        h = jnp.maximum(h, 0.0)
    out = jnp.dot(h.astype(jnp.bfloat16), w6,
                  preferred_element_type=jnp.float32) + b6
    return out[:, :d_out]


if __name__ == "__main__":
    # Small, module-consistent shapes.
    state_dim, action_dim, prediction_horizon = 4, 2, 5
    hidden_dim, num_steps = 32, 10
    d_x = state_dim + action_dim * prediction_horizon     # 14
    d_out = action_dim * prediction_horizon               # 10

    key = jax.random.PRNGKey(0)
    key, kx, kt, kx2, kt2 = jax.random.split(key, 5)

    params = init_diffusion_policy_params(
        key, state_dim, action_dim, hidden_dim, prediction_horizon)
    packed = pack_params(params, d_x=d_x, hidden_dim=hidden_dim, d_out=d_out)

    def check(x, t, batch):
        out = diffusion_policy_forward(x, t, packed,
                                       num_steps=num_steps, d_out=d_out)
        out = jax.block_until_ready(out)
        assert out.shape == (batch, d_out), out.shape
        # Tight check vs a reference using identical bf16/f32 numerics.
        ref_q = reference_forward_bf16(x, t, packed, num_steps, d_out)
        assert jnp.allclose(out, ref_q, atol=2e-3, rtol=2e-3), \
            "mismatch vs bf16-matmul reference"
        # Loose sanity check vs the exact f32 module semantics (bf16 weights
        # introduce ~1% quantization error by design).
        ref_f = reference_forward(x, t, params, num_steps)
        assert jnp.allclose(out, ref_f, atol=1e-1, rtol=1e-1), \
            "mismatch vs f32 reference beyond expected bf16 quantization error"

    # Case 1: tiny batch -> single 8-row tile.
    x = jax.random.normal(kx, (8, d_x), jnp.float32)
    t = jax.random.randint(kt, (8,), 1, num_steps + 1)
    check(x, t, 8)

    # Case 2: ragged batch -> Pallas-masked final block (no wrapper padding);
    # splits into 2 parallel tiles on 2-TensorCore chips, 1 tile otherwise.
    x2 = jax.random.normal(kx2, (37, d_x), jnp.float32)
    t2 = jax.random.randint(kt2, (37,), 1, num_steps + 1)
    check(x2, t2, 37)

    print("KERNEL_OK")
</pallas_src>

<mosaic_0001>
module attributes {stable_mosaic.version = 11 : i64} {
  func.func @_mlp_kernel(%arg0: i32, %arg1: memref<8x14xf32, #tpu.memory_space<vmem>>, %arg2: memref<8x1xi32, #tpu.memory_space<vmem>>, %arg3: memref<14x128xbf16, #tpu.memory_space<vmem>>, %arg4: memref<1x128xf32, #tpu.memory_space<vmem>>, %arg5: memref<1x128xf32, #tpu.memory_space<vmem>>, %arg6: memref<4x128x128xbf16, #tpu.memory_space<vmem>>, %arg7: memref<4x1x128xf32, #tpu.memory_space<vmem>>, %arg8: memref<128x128xbf16, #tpu.memory_space<vmem>>, %arg9: memref<1x128xf32, #tpu.memory_space<vmem>>, %arg10: memref<8x128xf32, #tpu.memory_space<vmem>>) attributes {dimension_semantics = [#tpu.dimension_semantics<parallel>], iteration_bounds = array<i64: 1>, scalar_prefetch = 0 : i64, scratch_operands = 0 : i64, tpu.core_type = #tpu.core_type<tc>, window_params = [{transform_indices = @transform_0, window_bounds = array<i64: 8, 14>}, {transform_indices = @transform_1, window_bounds = array<i64: 8, 1>}, {pipeline_mode = #tpu.pipeline_mode<synchronous>, transform_indices = @transform_2, window_bounds = array<i64: 14, 128>}, {pipeline_mode = #tpu.pipeline_mode<synchronous>, transform_indices = @transform_3, window_bounds = array<i64: 1, 128>}, {pipeline_mode = #tpu.pipeline_mode<synchronous>, transform_indices = @transform_4, window_bounds = array<i64: 1, 128>}, {pipeline_mode = #tpu.pipeline_mode<synchronous>, transform_indices = @transform_5, window_bounds = array<i64: 4, 128, 128>}, {pipeline_mode = #tpu.pipeline_mode<synchronous>, transform_indices = @transform_6, window_bounds = array<i64: 4, 1, 128>}, {pipeline_mode = #tpu.pipeline_mode<synchronous>, transform_indices = @transform_7, window_bounds = array<i64: 128, 128>}, {pipeline_mode = #tpu.pipeline_mode<synchronous>, transform_indices = @transform_8, window_bounds = array<i64: 1, 128>}, {transform_indices = @transform_9, window_bounds = array<i64: 8, 128>}]} {
    %c0 = arith.constant 0 : index
    %c0_0 = arith.constant 0 : index
    %0 = vector.load %arg2[%c0, %c0_0] : memref<8x1xi32, #tpu.memory_space<vmem>>, vector<8x1xi32>
    %1 = arith.sitofp %0 : vector<8x1xi32> to vector<8x1xf32>
    %cst = arith.constant 1.000000e-01 : f32
    %2 = vector.broadcast %cst : f32 to vector<8x1xf32>
    %3 = arith.mulf %1, %2 : vector<8x1xf32>
    %c0_1 = arith.constant 0 : index
    %c0_2 = arith.constant 0 : index
    %4 = vector.load %arg1[%c0_1, %c0_2] : memref<8x14xf32, #tpu.memory_space<vmem>>, vector<8x14xf32>
    %5 = arith.truncf %4 : vector<8x14xf32> to vector<8x14xbf16>
    %c0_3 = arith.constant 0 : index
    %c0_4 = arith.constant 0 : index
    %6 = vector.load %arg3[%c0_3, %c0_4] : memref<14x128xbf16, #tpu.memory_space<vmem>>, vector<14x128xbf16>
    %cst_5 = arith.constant dense<0.000000e+00> : vector<8x128xf32>
    %7 = tpu.matmul %5, %6, %cst_5 {dimension_numbers = #tpu.dot_dimension_numbers<[1], [0], [0], [1], [0, 0, 1, 1], [], []>} : vector<8x14xbf16>, vector<14x128xbf16>, vector<8x128xf32> -> vector<8x128xf32>
    %c0_6 = arith.constant 0 : index
    %c0_7 = arith.constant 0 : index
    %8 = vector.load %arg4[%c0_6, %c0_7] : memref<1x128xf32, #tpu.memory_space<vmem>>, vector<1x128xf32>
    %9 = vector.broadcast %3 : vector<8x1xf32> to vector<8x128xf32>
    %10 = vector.broadcast %8 : vector<1x128xf32> to vector<8x128xf32>
    %11 = arith.mulf %9, %10 : vector<8x128xf32>
    %12 = arith.addf %7, %11 : vector<8x128xf32>
    %c0_8 = arith.constant 0 : index
    %c0_9 = arith.constant 0 : index
    %13 = vector.load %arg5[%c0_8, %c0_9] : memref<1x128xf32, #tpu.memory_space<vmem>>, vector<1x128xf32>
    %14 = vector.broadcast %13 : vector<1x128xf32> to vector<8x128xf32>
    %15 = arith.addf %12, %14 : vector<8x128xf32>
    %cst_10 = arith.constant 0.000000e+00 : f32
    %16 = vector.broadcast %cst_10 : f32 to vector<8x128xf32>
    %17 = arith.maximumf %15, %16 : vector<8x128xf32>
    %18 = arith.truncf %17 : vector<8x128xf32> to vector<8x128xbf16>
    %c0_11 = arith.constant 0 : index
    %c0_12 = arith.constant 0 : index
    %c0_13 = arith.constant 0 : index
    %19 = vector.load %arg6[%c0_11, %c0_12, %c0_13] : memref<4x128x128xbf16, #tpu.memory_space<vmem>>, vector<1x128x128xbf16>
    %20 = vector.shape_cast %19 : vector<1x128x128xbf16> to vector<128x128xbf16>
    %cst_14 = arith.constant dense<0.000000e+00> : vector<8x128xf32>
    %21 = tpu.matmul %18, %20, %cst_14 {dimension_numbers = #tpu.dot_dimension_numbers<[1], [0], [0], [1], [0, 0, 1, 1], [], []>} : vector<8x128xbf16>, vector<128x128xbf16>, vector<8x128xf32> -> vector<8x128xf32>
    %c0_15 = arith.constant 0 : index
    %c0_16 = arith.constant 0 : index
    %c0_17 = arith.constant 0 : index
    %22 = vector.load %arg7[%c0_15, %c0_16, %c0_17] : memref<4x1x128xf32, #tpu.memory_space<vmem>>, vector<1x1x128xf32>
    %23 = vector.shape_cast %22 : vector<1x1x128xf32> to vector<1x128xf32>
    %24 = vector.broadcast %23 : vector<1x128xf32> to vector<8x128xf32>
    %25 = arith.addf %21, %24 : vector<8x128xf32>
    %cst_18 = arith.constant 0.000000e+00 : f32
    %26 = vector.broadcast %cst_18 : f32 to vector<8x128xf32>
    %27 = arith.maximumf %25, %26 : vector<8x128xf32>
    %28 = arith.truncf %27 : vector<8x128xf32> to vector<8x128xbf16>
    %c1 = arith.constant 1 : index
    %c0_19 = arith.constant 0 : index
    %c0_20 = arith.constant 0 : index
    %29 = vector.load %arg6[%c1, %c0_19, %c0_20] : memref<4x128x128xbf16, #tpu.memory_space<vmem>>, vector<1x128x128xbf16>
    %30 = vector.shape_cast %29 : vector<1x128x128xbf16> to vector<128x128xbf16>
    %cst_21 = arith.constant dense<0.000000e+00> : vector<8x128xf32>
    %31 = tpu.matmul %28, %30, %cst_21 {dimension_numbers = #tpu.dot_dimension_numbers<[1], [0], [0], [1], [0, 0, 1, 1], [], []>} : vector<8x128xbf16>, vector<128x128xbf16>, vector<8x128xf32> -> vector<8x128xf32>
    %c1_22 = arith.constant 1 : index
    %c0_23 = arith.constant 0 : index
    %c0_24 = arith.constant 0 : index
    %32 = vector.load %arg7[%c1_22, %c0_23, %c0_24] : memref<4x1x128xf32, #tpu.memory_space<vmem>>, vector<1x1x128xf32>
    %33 = vector.shape_cast %32 : vector<1x1x128xf32> to vector<1x128xf32>
    %34 = vector.broadcast %33 : vector<1x128xf32> to vector<8x128xf32>
    %35 = arith.addf %31, %34 : vector<8x128xf32>
    %cst_25 = arith.constant 0.000000e+00 : f32
    %36 = vector.broadcast %cst_25 : f32 to vector<8x128xf32>
    %37 = arith.maximumf %35, %36 : vector<8x128xf32>
    %38 = arith.truncf %37 : vector<8x128xf32> to vector<8x128xbf16>
    %c2 = arith.constant 2 : index
    %c0_26 = arith.constant 0 : index
    %c0_27 = arith.constant 0 : index
    %39 = vector.load %arg6[%c2, %c0_26, %c0_27] : memref<4x128x128xbf16, #tpu.memory_space<vmem>>, vector<1x128x128xbf16>
    %40 = vector.shape_cast %39 : vector<1x128x128xbf16> to vector<128x128xbf16>
    %cst_28 = arith.constant dense<0.000000e+00> : vector<8x128xf32>
    %41 = tpu.matmul %38, %40, %cst_28 {dimension_numbers = #tpu.dot_dimension_numbers<[1], [0], [0], [1], [0, 0, 1, 1], [], []>} : vector<8x128xbf16>, vector<128x128xbf16>, vector<8x128xf32> -> vector<8x128xf32>
    %c2_29 = arith.constant 2 : index
    %c0_30 = arith.constant 0 : index
    %c0_31 = arith.constant 0 : index
    %42 = vector.load %arg7[%c2_29, %c0_30, %c0_31] : memref<4x1x128xf32, #tpu.memory_space<vmem>>, vector<1x1x128xf32>
    %43 = vector.shape_cast %42 : vector<1x1x128xf32> to vector<1x128xf32>
    %44 = vector.broadcast %43 : vector<1x128xf32> to vector<8x128xf32>
    %45 = arith.addf %41, %44 : vector<8x128xf32>
    %cst_32 = arith.constant 0.000000e+00 : f32
    %46 = vector.broadcast %cst_32 : f32 to vector<8x128xf32>
    %47 = arith.maximumf %45, %46 : vector<8x128xf32>
    %48 = arith.truncf %47 : vector<8x128xf32> to vector<8x128xbf16>
    %c3 = arith.constant 3 : index
    %c0_33 = arith.constant 0 : index
    %c0_34 = arith.constant 0 : index
    %49 = vector.load %arg6[%c3, %c0_33, %c0_34] : memref<4x128x128xbf16, #tpu.memory_space<vmem>>, vector<1x128x128xbf16>
    %50 = vector.shape_cast %49 : vector<1x128x128xbf16> to vector<128x128xbf16>
    %cst_35 = arith.constant dense<0.000000e+00> : vector<8x128xf32>
    %51 = tpu.matmul %48, %50, %cst_35 {dimension_numbers = #tpu.dot_dimension_numbers<[1], [0], [0], [1], [0, 0, 1, 1], [], []>} : vector<8x128xbf16>, vector<128x128xbf16>, vector<8x128xf32> -> vector<8x128xf32>
    %c3_36 = arith.constant 3 : index
    %c0_37 = arith.constant 0 : index
    %c0_38 = arith.constant 0 : index
    %52 = vector.load %arg7[%c3_36, %c0_37, %c0_38] : memref<4x1x128xf32, #tpu.memory_space<vmem>>, vector<1x1x128xf32>
    %53 = vector.shape_cast %52 : vector<1x1x128xf32> to vector<1x128xf32>
    %54 = vector.broadcast %53 : vector<1x128xf32> to vector<8x128xf32>
    %55 = arith.addf %51, %54 : vector<8x128xf32>
    %cst_39 = arith.constant 0.000000e+00 : f32
    %56 = vector.broadcast %cst_39 : f32 to vector<8x128xf32>
    %57 = arith.maximumf %55, %56 : vector<8x128xf32>
    %58 = arith.truncf %57 : vector<8x128xf32> to vector<8x128xbf16>
    %c0_40 = arith.constant 0 : index
    %c0_41 = arith.constant 0 : index
    %59 = vector.load %arg8[%c0_40, %c0_41] : memref<128x128xbf16, #tpu.memory_space<vmem>>, vector<128x128xbf16>
    %cst_42 = arith.constant dense<0.000000e+00> : vector<8x128xf32>
    %60 = tpu.matmul %58, %59, %cst_42 {dimension_numbers = #tpu.dot_dimension_numbers<[1], [0], [0], [1], [0, 0, 1, 1], [], []>} : vector<8x128xbf16>, vector<128x128xbf16>, vector<8x128xf32> -> vector<8x128xf32>
    %c0_43 = arith.constant 0 : index
    %c0_44 = arith.constant 0 : index
    %61 = vector.load %arg9[%c0_43, %c0_44] : memref<1x128xf32, #tpu.memory_space<vmem>>, vector<1x128xf32>
    %62 = vector.broadcast %61 : vector<1x128xf32> to vector<8x128xf32>
    %63 = arith.addf %60, %62 : vector<8x128xf32>
    %c0_45 = arith.constant 0 : index
    %c0_46 = arith.constant 0 : index
    %64 = vector.load %arg10[%c0_45, %c0_46] : memref<8x128xf32, #tpu.memory_space<vmem>>, vector<8x128xf32>
    tpu.vector_store %arg10[%c0_45, %c0_46], %63 {strides = array<i32>} : memref<8x128xf32, #tpu.memory_space<vmem>>, vector<8x128xf32>,
    return
  }
  func.func @transform_0(%arg0: i32) -> (i32, i32) {
    %c0_i32 = arith.constant 0 : i32
    %c0_i32_0 = arith.constant 0 : i32
    return %arg0, %c0_i32 : i32, i32
  }
  func.func @transform_1(%arg0: i32) -> (i32, i32) {
    %c0_i32 = arith.constant 0 : i32
    %c0_i32_0 = arith.constant 0 : i32
    return %arg0, %c0_i32 : i32, i32
  }
  func.func @transform_2(%arg0: i32) -> (i32, i32) {
    %c0_i32 = arith.constant 0 : i32
    %c0_i32_0 = arith.constant 0 : i32
    %c0_i32_1 = arith.constant 0 : i32
    return %c0_i32, %c0_i32_0 : i32, i32
  }
  func.func @transform_3(%arg0: i32) -> (i32, i32) {
    %c0_i32 = arith.constant 0 : i32
    %c0_i32_0 = arith.constant 0 : i32
    %c0_i32_1 = arith.constant 0 : i32
    return %c0_i32, %c0_i32_0 : i32, i32
  }
  func.func @transform_4(%arg0: i32) -> (i32, i32) {
    %c0_i32 = arith.constant 0 : i32
    %c0_i32_0 = arith.constant 0 : i32
    %c0_i32_1 = arith.constant 0 : i32
    return %c0_i32, %c0_i32_0 : i32, i32
  }
  func.func @transform_5(%arg0: i32) -> (i32, i32, i32) {
    %c0_i32 = arith.constant 0 : i32
    %c0_i32_0 = arith.constant 0 : i32
    %c0_i32_1 = arith.constant 0 : i32
    %c0_i32_2 = arith.constant 0 : i32
    return %c0_i32, %c0_i32_0, %c0_i32_1 : i32, i32, i32
  }
  func.func @transform_6(%arg0: i32) -> (i32, i32, i32) {
    %c0_i32 = arith.constant 0 : i32
    %c0_i32_0 = arith.constant 0 : i32
    %c0_i32_1 = arith.constant 0 : i32
    %c0_i32_2 = arith.constant 0 : i32
    return %c0_i32, %c0_i32_0, %c0_i32_1 : i32, i32, i32
  }
  func.func @transform_7(%arg0: i32) -> (i32, i32) {
    %c0_i32 = arith.constant 0 : i32
    %c0_i32_0 = arith.constant 0 : i32
    %c0_i32_1 = arith.constant 0 : i32
    return %c0_i32, %c0_i32_0 : i32, i32
  }
  func.func @transform_8(%arg0: i32) -> (i32, i32) {
    %c0_i32 = arith.constant 0 : i32
    %c0_i32_0 = arith.constant 0 : i32
    %c0_i32_1 = arith.constant 0 : i32
    return %c0_i32, %c0_i32_0 : i32, i32
  }
  func.func @transform_9(%arg0: i32) -> (i32, i32) {
    %c0_i32 = arith.constant 0 : i32
    %c0_i32_0 = arith.constant 0 : i32
    return %arg0, %c0_i32 : i32, i32
  }
}

</mosaic_0001>

<bundles_post_ra>
// kernel: diffusion_policy_forward.1
= control target key start
LH: loop header
LB: loop body
LE: loop exit
PB: predicated region body
PF: predicated region fallthrough
CT: control target
= control target key end

     0   :  { %14 = vsyncpa [#allocation3], 0  ;;  %s1235_s0 = inlined_call_operand.vmem [shape: f32[8,14], index: 0, kind: input, shape index: {}]   ;;  %s1236_s1 = inlined_call_operand.vmem [shape: s32[8,1], index: 1, kind: input, shape index: {}]   ;;  %s1237_s2 = inlined_call_operand.vmem [shape: bf16[14,128], index: 2, kind: input, shape index: {}]   ;;  %s1238_s3 = inlined_call_operand.vmem [shape: f32[1,128], index: 3, kind: input, shape index: {}]   ;;  %s1239_s4 = inlined_call_operand.vmem [shape: f32[1,128], index: 4, kind: input, shape index: {}]   ;;  %s1240_s5 = inlined_call_operand.hbm [shape: bf16[4,128,128], index: 5, kind: input, shape index: {}]   ;;  %s1241_s6 = inlined_call_operand.vmem [shape: f32[4,1,128], index: 6, kind: input, shape index: {}]   ;;  %s1242_s7 = inlined_call_operand.hbm [shape: bf16[128,128], index: 7, kind: input, shape index: {}]   ;;  %s1243_s8 = inlined_call_operand.vmem [shape: f32[1,128], index: 8, kind: input, shape index: {}]   ;;  %s1244_s9 = inlined_call_operand.hbm [shape: f32[8,128], index: 9, kind: output, shape index: {}]  }
   0x1   :  { %15 = vsyncpa [#allocation6], 0 }
   0x2   :  { %16 = vsyncpa [#allocation4], 0  ;;  %s1058_s30 = smov [#allocation2]   ;;  %s986_s13 = scalar_lea.hbm %s1240_s5, 4096 }
   0x3   :  { %s32_s10 = sshll.u32 %s1058_s30, 4  ;;  %p987_p0 = scmp.ne.s32.totalorder %s1240_s5, %s986_s13  ;;  %s33_s10 = int_to_ptr.vmem [resolvable:$true] %s32_s10 }
   0x4   :  { %p990_p1 = scmp.lt.u32.totalorder %s986_s13, %s1240_s5 }
   0x6   :  { %p992_p2 = pnand %p990_p1, %p987_p0 }
   0x8   :  { %995 = shalt.err (!%p992_p2)
}
   0x9   :  { %s996_s18 = scalar_lea.vmem %s33_s10, 4096  ;;  %p1001_p4 = scmp.lt.s32.totalorder %s33_s10, %s33_s10 }
   0xa   :  { %p997_p3 = scmp.ne.s32.totalorder %s33_s10, %s996_s18  ;;  %p1002_p5 = scmp.lt.s32.totalorder %s996_s18, %s996_s18 }
   0xc   :  { %p1003_p6 = por %p1002_p5, %p1001_p4 }
   0xe   :  { %p1004_p7 = pnand %p1003_p6, %p997_p3 }
  0x10   :  { %1007 = shalt.err (!%p1004_p7)
}
  0x11   :  { %s1059_s19 = smov 64   ;;  %s1060_s20 = smov 4  }
  0x12   :  { %38 = dma.hbm_to_vmem [thread:$0]  %s1240_s5, 4096, %s33_s10, [#allocation3], %s1059_s19, %s1059_s19, %s1060_s20  }
  0x13   :  { %s1061_s23 = smov [#allocation5]   ;;  %s1008_s27 = scalar_lea.hbm %s1242_s7, 1024 }
  0x14   :  { %s46_s24 = sshll.u32 %s1061_s23, 4  ;;  %p1009_p8 = scmp.ne.s32.totalorder %s1242_s7, %s1008_s27  ;;  %s47_s24 = int_to_ptr.vmem [resolvable:$true] %s46_s24 }
  0x15   :  { %p1012_p9 = scmp.lt.u32.totalorder %s1008_s27, %s1242_s7 }
  0x17   :  { %p1014_p10 = pnand %p1012_p9, %p1009_p8 }
  0x19   :  { %1017 = shalt.err (!%p1014_p10)
}
  0x1a   :  { %s1018_s12 = scalar_lea.vmem %s47_s24, 1024  ;;  %p1023_p12 = scmp.lt.s32.totalorder %s47_s24, %s47_s24 }
  0x1b   :  { %p1019_p11 = scmp.ne.s32.totalorder %s47_s24, %s1018_s12  ;;  %p1024_p13 = scmp.lt.s32.totalorder %s1018_s12, %s1018_s12 }
  0x1d   :  { %p1025_p0 = por %p1024_p13, %p1023_p12 }
  0x1f   :  { %p1026_p1 = pnand %p1025_p0, %p1019_p11 }
  0x21   :  { %1029 = shalt.err (!%p1026_p1)
}
  0x22   :  { %52 = dma.hbm_to_vmem [thread:$0]  %s1242_s7, 1024, %s47_s24, [#allocation6], %s1059_s19, %s1059_s19, %s1060_s20  }
  0x23   :  { %1052 = dma.done.wait [#allocation3], 4096  }
  0x24   :  { %1053 = vsyncadd [#allocation3], 4294963200 }
  0x25   :  { %1054 = dma.done.wait [#allocation6], 1024  }
  0x26   :  { %1055 = vsyncadd [#allocation6], 4294966272  ;;  %v1062_v0 = vmov 0.0   ;;  %vm1063_vm0 = vmmov 0   ;;  %v1064_v1 = vmov 0   ;;  %vm91_vm1 = vcmask 1046528  }
  0x27   :  { %830 = vmatprep.subr.bf16.mxu0 %v1062_v0  ;;  %832 = vmatprep.mubr.msk.bf16.mxu0 %vm1063_vm0, %v1062_v0  ;;  %v945_v2 = vld [vmem:[%s1237_s2] sm:$0x7f]   ;;  %vm87_vm2 = vcmask 113664   ;;  %v947_v10 = vld [vmem:[#allocation2 + $0x8] sm:$0xff]   ;;  %v948_v11 = vld [vmem:[#allocation2 + $0x10] sm:$0xff]   ;;  %s1065_s27 = smov [#allocation7]  }
  0x28   :  { %944 = vset.pattern.permute.xlu0 %v1064_v1  ;;  %836 = vmatprep.subr.bf16.mxu1 %v1062_v0  ;;  %v65_v3 = vld [vmem:[%s1235_s0] sm:$0xff]  ;;  %v93_v5 = vsel %vm91_vm1, %v945_v2, 0  ;;  %v949_v12 = vld [vmem:[#allocation2 + $0x18] sm:$0xff]   ;;  %v951_v14 = vld [vmem:[#allocation2 + $0x28] sm:$0xff]   ;;  %s721_s28 = sshll.u32 %s1065_s27, 4  ;;  %s722_s28 = int_to_ptr.vmem [resolvable:$true] %s721_s28 }
  0x29   :  { %852 = vmatprep.mubr.msk.bf16.mxu1 %vm1063_vm0, %v1062_v0  ;;  %v62_v4 = vld [vmem:[%s1236_s1] sm:$0xff]  ;;  %v66_v6 = vpack.c.bf16 %v65_v3, %v65_v3  ;;  %831 = vmatpush3.bf16.msra.mxu0 %v93_v5  ;;  %v952_v15 = vld [vmem:[#allocation2 + $0x30] sm:$0xff]   ;;  %v953_v16 = vld [vmem:[#allocation2 + $0x38] sm:$0xff]   ;;  %p1035_p3 = scmp.lt.s32.totalorder %s722_s28, %s722_s28 }
  0x2a   :  { %v63_v7 = vcvt.s32.f32 %v62_v4  ;;  %v946_v8 = vld [vmem:[#allocation2] sm:$0xff]   ;;  %856 = vmatprep.subr.bf16.mxu0 %v1062_v0  ;;  %v955_v18 = vld [vmem:[#allocation2 + $0x48] sm:$0xff]   ;;  %v956_v19 = vld [vmem:[#allocation2 + $0x50] sm:$0xff]  }
  0x2b   :  { %837 = vmatpush3.bf16.msra.mxu1 %v946_v8  ;;  %v950_v13 = vld [vmem:[#allocation2 + $0x20] sm:$0xff]   ;;  %v957_v20 = vld [vmem:[#allocation2 + $0x58] sm:$0xff]   ;;  %v959_v22 = vld [vmem:[#allocation2 + $0x68] sm:$0xff]  }
  0x2c   :  { %v64_v9 = vmul.f32 0.1, %v63_v7  ;;  %838 = vmatprep.subr.bf16.mxu1 %v1062_v0  ;;  %833 = vmatmul.mubr.msk.bf16.vlgmr.msra.gmra.mrb[0].mxu0 %vm87_vm2, %v66_v6  ;;  %v954_v17 = vld [vmem:[#allocation2 + $0x40] sm:$0xff]   ;;  %v960_v35 = vld [vmem:[#allocation2 + $0x70] sm:$0xff]   ;;  %v961_v36 = vld [vmem:[#allocation2 + $0x78] sm:$0xff]  }
  0x2d   :  { %872 = vmatprep.mubr.msk.bf16.mxu0 %vm1063_vm0, %v1062_v0  ;;  %857 = vmatpush3.bf16.msra.mxu0 %v954_v17  ;;  %v958_v21 = vld [vmem:[#allocation2 + $0x60] sm:$0xff]   ;;  %v963_v38 = vld [vmem:[#allocation2 + $0x88] sm:$0xff]   ;;  %v964_v39 = vld [vmem:[#allocation2 + $0x90] sm:$0xff]  }
  0x2e   :  { %72 = vperm.xlu0 %944, %v64_v9   ;;  %858 = vmatprep.subr.bf16.mxu0 %v1062_v0  ;;  %v731_v23 = vld [vmem:[%s1238_s3] ss:$0 sm:$0xff]  ;;  %v965_v40 = vld [vmem:[#allocation2 + $0x98] sm:$0xff]   ;;  %v967_v42 = vld [vmem:[#allocation2 + $0xa8] sm:$0xff]  }
  0x2f   :  { %839 = vmatpush3.bf16.msra.mxu1 %v947_v10  ;;  %v734_v27 = vld [vmem:[%s1239_s4] ss:$0 sm:$0xff]  ;;  %v968_v51 = vld [vmem:[#allocation2 + $0xb0] sm:$0xff]   ;;  %v969_v52 = vld [vmem:[#allocation2 + $0xb8] sm:$0xff]  }
  0x30   :  { %840 = vmatprep.subr.bf16.mxu1 %v1062_v0  ;;  %v962_v37 = vld [vmem:[#allocation2 + $0x80] sm:$0xff]   ;;  %v971_v54 = vld [vmem:[#allocation2 + $0xc8] sm:$0xff]   ;;  %v972_v55 = vld [vmem:[#allocation2 + $0xd0] sm:$0xff]  }
  0x31   :  { %859 = vmatpush3.bf16.msra.mxu0 %v955_v18  ;;  %v966_v41 = vld [vmem:[#allocation2 + $0xa0] sm:$0xff]   ;;  %v973_v56 = vld [vmem:[#allocation2 + $0xd8] sm:$0xff]   ;;  %v975_v58 = vld [vmem:[#allocation2 + $0xe8] sm:$0xff]  }
  0x32   :  { %860 = vmatprep.subr.bf16.mxu0 %v1062_v0  ;;  %v735_v43 = vld [vmem:[%s1241_s6] ss:$0 sm:$0xff]  ;;  %v745_v59 = vld [vmem:[%s1241_s6 + $0x1] ss:$0 sm:$0xff]  ;;  %v976_v4 = vld [vmem:[#allocation2 + $0xf0] sm:$0xff]  }
  0x33   :  { %841 = vmatpush3.bf16.msra.mxu1 %v948_v11  ;;  %v970_v53 = vld [vmem:[#allocation2 + $0xc0] sm:$0xff]   ;;  %v977_v5 = vld [vmem:[#allocation2 + $0xf8] sm:$0xff]   ;;  %v979_v7 = vld [vmem:[#allocation5 + $0x8] sm:$0xff]  }
  0x34   :  { %842 = vmatprep.subr.bf16.mxu1 %v1062_v0  ;;  %v974_v57 = vld [vmem:[#allocation2 + $0xe0] sm:$0xff]   ;;  %v980_v8 = vld [vmem:[#allocation5 + $0x10] sm:$0xff]   ;;  %v981_v9 = vld [vmem:[#allocation5 + $0x18] sm:$0xff]  }
  0x35   :  { %861 = vmatpush3.bf16.msra.mxu0 %v956_v19  ;;  %v978_v6 = vld [vmem:[#allocation5] sm:$0xff]   ;;  %v983_v11 = vld [vmem:[#allocation5 + $0x28] sm:$0xff]  }
  0x36   :  { %862 = vmatprep.subr.bf16.mxu0 %v1062_v0  ;;  %v982_v10 = vld [vmem:[#allocation5 + $0x20] sm:$0xff]  }
  0x37   :  { %843 = vmatpush3.bf16.msra.mxu1 %v949_v12  ;;  %v755_v12 = vld [vmem:[%s1241_s6 + $0x2] ss:$0 sm:$0xff] }
  0x38   :  { %844 = vmatprep.subr.bf16.mxu1 %v1062_v0 }
  0x39   :  { %863 = vmatpush3.bf16.msra.mxu0 %v957_v20  ;;  %v984_v20 = vld [vmem:[#allocation5 + $0x30] sm:$0xff]  }
  0x3a   :  { %864 = vmatprep.subr.bf16.mxu0 %v1062_v0 }
  0x3b   :  { %845 = vmatpush3.bf16.msra.mxu1 %v950_v13 }
  0x3c   :  { %846 = vmatprep.subr.bf16.mxu1 %v1062_v0 }
  0x3d   :  { %865 = vmatpush3.bf16.msra.mxu0 %v958_v21  ;;  %v985_v21 = vld [vmem:[#allocation5 + $0x38] sm:$0xff]  }
  0x3e   :  { %866 = vmatprep.subr.bf16.mxu0 %v1062_v0 }
  0x3f   :  { %847 = vmatpush3.bf16.msra.mxu1 %v951_v14 }
  0x40   :  { %848 = vmatprep.subr.bf16.mxu1 %v1062_v0 }
  0x41   :  { %867 = vmatpush3.bf16.msra.mxu0 %v959_v22  ;;  %v765_v22 = vld [vmem:[%s1241_s6 + $0x3] ss:$0 sm:$0xff]  ;;  %s1030_s6 = scalar_lea.vmem %s722_s28, 128 }
  0x42   :  { %868 = vmatprep.subr.bf16.mxu0 %v1062_v0  ;;  %p1031_p2 = scmp.ne.s32.totalorder %s722_s28, %s1030_s6  ;;  %p1036_p4 = scmp.lt.s32.totalorder %s1030_s6, %s1030_s6 }
  0x43   :  { %849 = vmatpush3.bf16.msra.mxu1 %v952_v15 }
  0x44   :  { %850 = vmatprep.subr.bf16.mxu1 %v1062_v0  ;;  %p1037_p5 = por %p1036_p4, %p1035_p3 }
  0x45   :  { %869 = vmatpush3.bf16.msra.mxu0 %v960_v35 }
  0x46   :  { %870 = vmatprep.subr.bf16.mxu0 %v1062_v0  ;;  %p1038_p6 = pnand %p1037_p5, %p1031_p2 }
  0x47   :  { %851 = vmatpush3.bf16.msra.mxu1 %v953_v16 }
  0x48   :  { %876 = vmatprep.subr.bf16.mxu1 %v1062_v0 }
  0x49   :  { %871 = vmatpush3.bf16.msra.mxu0 %v961_v36 }
  0x4a   :  { %896 = vmatprep.subr.bf16.mxu0 %v1062_v0 }
  0xad   :  { %v73_v24 = vpop.permute.xlu0 %72 }
  0xae   :  { %v81_v25 = vmul.f32 %v731_v23, %v73_v24 }
  0xff   :  { %v129_v26 = vpop.f32.mrb[0].mxu0 }
 0x100   :  { %v130_v28 = vadd.f32 %v129_v26, %v81_v25  ;;  %v834_v29 = vpop.f32.mrb[1].mxu0 }
 0x101   :  { %v132_v30 = vpop.f32.mrb[2].mxu0 }
 0x102   :  { %v142_v31 = vadd.f32 %v734_v27, %v130_v28  ;;  %v835_v32 = vpop.f32.mrb[3].mxu0  ;;  %v774_v30 = vld [vmem:[%s1243_s8] ss:$0 sm:$0xff] }
 0x104   :  { %v143_v33 = vmax.f32 %v142_v31, 0.0 }
 0x106   :  { %v144_v34 = vpack.c.bf16 %v143_v33, %v143_v33 }
 0x108   :  { %853 = vmatmul.mubr.bf16.vlgmr.msra.gmra.mrb[0].mxu1 %v144_v34 }
 0x109   :  { %892 = vmatprep.mubr.msk.bf16.mxu1 %vm1063_vm0, %v1062_v0  ;;  %877 = vmatpush3.bf16.msra.mxu1 %v962_v37 }
 0x10a   :  { %878 = vmatprep.subr.bf16.mxu1 %v1062_v0 }
 0x10d   :  { %879 = vmatpush3.bf16.msra.mxu1 %v963_v38 }
 0x10e   :  { %880 = vmatprep.subr.bf16.mxu1 %v1062_v0 }
 0x111   :  { %881 = vmatpush3.bf16.msra.mxu1 %v964_v39 }
 0x112   :  { %882 = vmatprep.subr.bf16.mxu1 %v1062_v0 }
 0x115   :  { %883 = vmatpush3.bf16.msra.mxu1 %v965_v40 }
 0x116   :  { %884 = vmatprep.subr.bf16.mxu1 %v1062_v0 }
 0x119   :  { %885 = vmatpush3.bf16.msra.mxu1 %v966_v41 }
 0x11a   :  { %886 = vmatprep.subr.bf16.mxu1 %v1062_v0 }
 0x11d   :  { %887 = vmatpush3.bf16.msra.mxu1 %v967_v42 }
 0x11e   :  { %888 = vmatprep.subr.bf16.mxu1 %v1062_v0 }
 0x121   :  { %889 = vmatpush3.bf16.msra.mxu1 %v968_v51 }
 0x122   :  { %890 = vmatprep.subr.bf16.mxu1 %v1062_v0 }
 0x125   :  { %891 = vmatpush3.bf16.msra.mxu1 %v969_v52 }
 0x126   :  { %916 = vmatprep.subr.bf16.mxu1 %v1062_v0 }
 0x1db   :  { %v250_v44 = vpop.f32.mrb[0].mxu1 }
 0x1dc   :  { %v251_v45 = vadd.f32 %v735_v43, %v250_v44  ;;  %v854_v46 = vpop.f32.mrb[1].mxu1 }
 0x1dd   :  { %v253_v47 = vpop.f32.mrb[2].mxu1 }
 0x1de   :  { %v256_v48 = vmax.f32 %v251_v45, 0.0  ;;  %v855_v49 = vpop.f32.mrb[3].mxu1 }
 0x1e0   :  { %v257_v50 = vpack.c.bf16 %v256_v48, %v256_v48 }
 0x1e2   :  { %873 = vmatmul.mubr.bf16.vlgmr.msra.gmra.mrb[4].mxu0 %v257_v50 }
 0x1e3   :  { %912 = vmatprep.mubr.msk.bf16.mxu0 %vm1063_vm0, %v1062_v0  ;;  %897 = vmatpush3.bf16.msra.mxu0 %v970_v53 }
 0x1e4   :  { %898 = vmatprep.subr.bf16.mxu0 %v1062_v0 }
 0x1e7   :  { %899 = vmatpush3.bf16.msra.mxu0 %v971_v54 }
 0x1e8   :  { %900 = vmatprep.subr.bf16.mxu0 %v1062_v0 }
 0x1eb   :  { %901 = vmatpush3.bf16.msra.mxu0 %v972_v55 }
 0x1ec   :  { %902 = vmatprep.subr.bf16.mxu0 %v1062_v0 }
 0x1ef   :  { %903 = vmatpush3.bf16.msra.mxu0 %v973_v56 }
 0x1f0   :  { %904 = vmatprep.subr.bf16.mxu0 %v1062_v0 }
 0x1f3   :  { %905 = vmatpush3.bf16.msra.mxu0 %v974_v57 }
 0x1f4   :  { %906 = vmatprep.subr.bf16.mxu0 %v1062_v0 }
 0x1f7   :  { %907 = vmatpush3.bf16.msra.mxu0 %v975_v58 }
 0x1f8   :  { %908 = vmatprep.subr.bf16.mxu0 %v1062_v0 }
 0x1fb   :  { %909 = vmatpush3.bf16.msra.mxu0 %v976_v4 }
 0x1fc   :  { %910 = vmatprep.subr.bf16.mxu0 %v1062_v0 }
 0x1ff   :  { %911 = vmatpush3.bf16.msra.mxu0 %v977_v5 }
 0x2b5   :  { %v365_v60 = vpop.f32.mrb[4].mxu0 }
 0x2b6   :  { %v366_v61 = vadd.f32 %v745_v59, %v365_v60  ;;  %v874_v62 = vpop.f32.mrb[5].mxu0 }
 0x2b7   :  { %v368_v63 = vpop.f32.mrb[6].mxu0 }
 0x2b8   :  { %v371_v1 = vmax.f32 %v366_v61, 0.0  ;;  %v875_v2 = vpop.f32.mrb[7].mxu0 }
 0x2ba   :  { %v372_v3 = vpack.c.bf16 %v371_v1, %v371_v1 }
 0x2bc   :  { %893 = vmatmul.mubr.bf16.vlgmr.msra.gmra.mrb[4].mxu1 %v372_v3 }
 0x2bd   :  { %932 = vmatprep.mubr.msk.bf16.mxu1 %vm1063_vm0, %v1062_v0  ;;  %917 = vmatpush3.bf16.msra.mxu1 %v978_v6 }
 0x2be   :  { %918 = vmatprep.subr.bf16.mxu1 %v1062_v0 }
 0x2c1   :  { %919 = vmatpush3.bf16.msra.mxu1 %v979_v7 }
 0x2c2   :  { %920 = vmatprep.subr.bf16.mxu1 %v1062_v0 }
 0x2c5   :  { %921 = vmatpush3.bf16.msra.mxu1 %v980_v8 }
 0x2c6   :  { %922 = vmatprep.subr.bf16.mxu1 %v1062_v0 }
 0x2c9   :  { %923 = vmatpush3.bf16.msra.mxu1 %v981_v9 }
 0x2ca   :  { %924 = vmatprep.subr.bf16.mxu1 %v1062_v0 }
 0x2cd   :  { %925 = vmatpush3.bf16.msra.mxu1 %v982_v10 }
 0x2ce   :  { %926 = vmatprep.subr.bf16.mxu1 %v1062_v0 }
 0x2d1   :  { %927 = vmatpush3.bf16.msra.mxu1 %v983_v11 }
 0x2d2   :  { %928 = vmatprep.subr.bf16.mxu1 %v1062_v0 }
 0x2d5   :  { %929 = vmatpush3.bf16.msra.mxu1 %v984_v20 }
 0x2d6   :  { %930 = vmatprep.subr.bf16.mxu1 %v1062_v0 }
 0x2d9   :  { %931 = vmatpush3.bf16.msra.mxu1 %v985_v21 }
 0x38f   :  { %v480_v13 = vpop.f32.mrb[4].mxu1 }
 0x390   :  { %v481_v14 = vadd.f32 %v755_v12, %v480_v13  ;;  %v894_v15 = vpop.f32.mrb[5].mxu1 }
 0x391   :  { %v483_v16 = vpop.f32.mrb[6].mxu1 }
 0x392   :  { %v486_v17 = vmax.f32 %v481_v14, 0.0  ;;  %v895_v18 = vpop.f32.mrb[7].mxu1 }
 0x394   :  { %v487_v19 = vpack.c.bf16 %v486_v17, %v486_v17 }
 0x396   :  { %913 = vmatmul.mubr.bf16.vlgmr.msra.gmra.mrb[8].mxu0 %v487_v19 }
 0x469   :  { %v595_v23 = vpop.f32.mrb[8].mxu0 }
 0x46a   :  { %v596_v24 = vadd.f32 %v765_v22, %v595_v23  ;;  %v914_v25 = vpop.f32.mrb[9].mxu0 }
 0x46b   :  { %v598_v26 = vpop.f32.mrb[10].mxu0 }
 0x46c   :  { %v601_v27 = vmax.f32 %v596_v24, 0.0  ;;  %v915_v28 = vpop.f32.mrb[11].mxu0 }
 0x46e   :  { %v602_v29 = vpack.c.bf16 %v601_v27, %v601_v27 }
 0x470   :  { %933 = vmatmul.mubr.bf16.vlgmr.msra.gmra.mrb[8].mxu1 %v602_v29 }
 0x543   :  { %v708_v0 = vpop.f32.mrb[8].mxu1 }
 0x544   :  { %v709_v31 = vadd.f32 %v774_v30, %v708_v0  ;;  %v934_v32 = vpop.f32.mrb[9].mxu1 }
 0x545   :  { %v711_v33 = vpop.f32.mrb[10].mxu1 }
 0x546   :  { %714 = vst [vmem:[#allocation7] sm:$0xff] %v709_v31  ;;  %v935_v34 = vpop.f32.mrb[11].mxu1 }
 0x547   :  { %1041 = shalt.err (!%p1038_p6)
}
 0x548   :  { %s1042_s8 = scalar_lea.hbm %s1244_s9, 128 }
 0x549   :  { %p1043_p7 = scmp.ne.s32.totalorder %s1244_s9, %s1042_s8  ;;  %p1046_p8 = scmp.lt.u32.totalorder %s1042_s8, %s1244_s9 }
 0x54b   :  { %p1048_p9 = pnand %p1046_p8, %p1043_p7 }
 0x54d   :  { %1051 = shalt.err (!%p1048_p9)
}
 0x54e   :  { %724 = dma.vmem_to_hbm [thread:$0]  %s722_s28, 128, %s1244_s9, [#allocation4]  }
 0x54f   :  { %1056 = dma.done.wait [#allocation4], 128  }
 0x550   :  { %1057 = vsyncadd [#allocation4], 4294967168 }
 0x551   :  { %728 = vsyncpa [#allocation3], 1 }
 0x552   :  { %729 = vsyncpa [#allocation6], 1 }
 0x553   :  { %730 = vsyncpa [#allocation4], 1 }

</bundles_post_ra>
